<compile_context>
chip_gen: v6e
topology: v6e:2x2x1
jax: 0.10.0
libtpu: 0.0.40
codegen_flags: <defaults>
</compile_context>

<pallas_src>
import functools

import jax
import jax.numpy as jnp
from jax.experimental import pallas as pl
from jax.experimental.pallas import tpu as pltpu


_SUBLANE = 8
_LANE = 128


def _round_up(n, m):
    return ((n + m - 1) // m) * m


def mlp_kernel(x_ref,
               w0_ref, b0_ref,
               w1_ref, b1_ref,
               w2_ref, b2_ref,
               w3_ref, b3_ref,
               out_ref,
               *, d_out):
    # x tile arrives f32 straight from HBM; cast to bf16 in-kernel (VPU) so the
    # wrapper never makes an extra HBM read+write pass over the input.
    x = x_ref[...].astype(jnp.bfloat16)

    # input_linear: d_in -> d_hidden_pad  (bf16 MXU, f32 accumulate + bias)
    h = jnp.dot(x, w0_ref[...], preferred_element_type=jnp.float32) + b0_ref[...]

    # hidden block 1: ReLU -> Dropout(identity) -> Linear
    h = jnp.maximum(h, 0.0).astype(jnp.bfloat16)
    h = jnp.dot(h, w1_ref[...], preferred_element_type=jnp.float32) + b1_ref[...]

    # hidden block 2: ReLU -> Dropout(identity) -> Linear
    h = jnp.maximum(h, 0.0).astype(jnp.bfloat16)
    h = jnp.dot(h, w2_ref[...], preferred_element_type=jnp.float32) + b2_ref[...]

    # output layer: ReLU -> Dropout(identity) -> Linear (padded to 128 lanes)
    h = jnp.maximum(h, 0.0).astype(jnp.bfloat16)
    logits = jnp.dot(h, w3_ref[...], preferred_element_type=jnp.float32) + b3_ref[...]

    # Mask padded output lanes so they contribute nothing to the softmax
    # (padded weight/bias columns are zero -> logits 0 there, which would
    #  otherwise pollute max / sum).
    lane = jax.lax.broadcasted_iota(jnp.int32, logits.shape, dimension=1)
    logits = jnp.where(lane < d_out, logits, jnp.float32(-1e30))

    # Numerically-stable softmax over the last dim, fully in f32.
    m = jnp.max(logits, axis=-1, keepdims=True)
    e = jnp.exp(logits - m)
    denom = jnp.sum(e, axis=-1, keepdims=True)
    # Exact f32 normalization (no approx reciprocal) -> rows sum to 1 to f32 eps;
    # only the bf16 output store quantizes the probabilities (<~2e-3).
    out_ref[...] = (e / denom).astype(out_ref.dtype)


def _prepare_params(params, d_hidden_pad, d_out_pad):
    """Zero-pad hidden/out dims to lane multiples; weights -> bf16, biases -> f32."""
    (w0, b0), (w1, b1), (w2, b2), (w3, b3) = params

    def pad(w, b, in_pad, out_pad):
        fi, fo = w.shape
        w = jnp.pad(w, ((0, in_pad - fi), (0, out_pad - fo)))
        b = jnp.pad(b, ((0, 0), (0, out_pad - fo)))
        return w.astype(jnp.bfloat16), b.astype(jnp.float32)

    d_in = w0.shape[0]
    return (
        pad(w0, b0, d_in, d_hidden_pad),
        pad(w1, b1, d_hidden_pad, d_hidden_pad),
        pad(w2, b2, d_hidden_pad, d_hidden_pad),
        pad(w3, b3, d_hidden_pad, d_out_pad),
    )


def mlp_forward(pixel_values, params, *, block_b=1024):
    """pixel_values: (B, C, H, W) float32. Returns softmax probs (B, d_out) f32."""
    B = pixel_values.shape[0]
    x = pixel_values.reshape(B, -1).astype(jnp.float32)    # torch.flatten(x, 1)
    d_in = x.shape[1]

    d_hidden = params[0][0].shape[1]
    d_out = params[3][0].shape[1]
    d_hidden_pad = _round_up(d_hidden, _LANE)
    d_out_pad = _round_up(d_out, _LANE)

    (w0, b0), (w1, b1), (w2, b2), (w3, b3) = _prepare_params(
        params, d_hidden_pad, d_out_pad)

    # Pad the batch only to a sublane multiple (8) -- at most 7 wasted rows --
    # instead of a full tile; the grid handles a ragged/smaller last tile.
    b_pad = _round_up(B, _SUBLANE)
    if b_pad != B:
        x = jnp.pad(x, ((0, b_pad - B), (0, 0)))

    # Row tile: as large as possible (amortize per-grid-step overhead), but keep
    # >=2 grid steps when the batch allows so the "parallel" axis can be sharded
    # across v7x's two TensorCores.
    tb = min(block_b, b_pad)
    if b_pad >= 2 * _SUBLANE and b_pad // tb < 2:
        tb = _round_up(pl.cdiv(b_pad, 2), _SUBLANE)
    grid = (pl.cdiv(b_pad, tb),)

    const_spec = lambda arr: pl.BlockSpec(arr.shape, lambda i: (0, 0))

    # Advisory cost estimate: four matmuls per row, exp over d_out_pad lanes,
    # f32 input stream + bf16 output stream + (small) resident weights.
    flops = 2 * b_pad * (d_in * d_hidden_pad
                         + 2 * d_hidden_pad * d_hidden_pad
                         + d_hidden_pad * d_out_pad)
    weight_bytes = (2 * (d_in * d_hidden_pad + 2 * d_hidden_pad * d_hidden_pad
                         + d_hidden_pad * d_out_pad)
                    + 4 * (3 * d_hidden_pad + d_out_pad))
    bytes_accessed = b_pad * d_in * 4 + b_pad * d_out_pad * 2 + weight_bytes
    cost = pl.CostEstimate(flops=int(flops),
                           transcendentals=int(b_pad * d_out_pad),
                           bytes_accessed=int(bytes_accessed))

    out = pl.pallas_call(
        functools.partial(mlp_kernel, d_out=d_out),
        out_shape=jax.ShapeDtypeStruct((b_pad, d_out_pad), jnp.bfloat16),
        grid=grid,
        in_specs=[
            pl.BlockSpec((tb, d_in), lambda i: (i, 0)),    # x: tiled over batch
            const_spec(w0), const_spec(b0),                # weights: VMEM-resident
            const_spec(w1), const_spec(b1),
            const_spec(w2), const_spec(b2),
            const_spec(w3), const_spec(b3),
        ],
        out_specs=pl.BlockSpec((tb, d_out_pad), lambda i: (i, 0)),
        compiler_params=pltpu.CompilerParams(
            dimension_semantics=("parallel",),
            vmem_limit_bytes=48 * 1024 * 1024,   # v7x-safe (64 MiB chip), ample for v5e/v6e
        ),
        cost_estimate=cost,
    )(x, w0, b0, w1, b1, w2, b2, w3, b3)

    return out[:B, :d_out].astype(jnp.float32)


def init_params(key, d_in, d_hidden, d_out):
    """Deterministic Kaiming-uniform-ish init; weights stored as (in, out)."""
    def linear(k, fan_in, fan_out):
        kw, kb = jax.random.split(k)
        bound = 1.0 / jnp.sqrt(fan_in)
        w = jax.random.uniform(kw, (fan_in, fan_out), jnp.float32, -bound, bound)
        b = jax.random.uniform(kb, (1, fan_out), jnp.float32, -bound, bound)
        return w, b

    k0, k1, k2, k3 = jax.random.split(key, 4)
    return (
        linear(k0, d_in, d_hidden),      # input_linear
        linear(k1, d_hidden, d_hidden),  # hidden layer 1
        linear(k2, d_hidden, d_hidden),  # hidden layer 2
        linear(k3, d_hidden, d_out),     # output layer
    )


def mlp_reference(pixel_values, params):
    """Pure-JAX f32 reference for correctness checking."""
    B = pixel_values.shape[0]
    h = pixel_values.reshape(B, -1)
    (w0, b0), (w1, b1), (w2, b2), (w3, b3) = params
    h = h @ w0 + b0
    h = jnp.maximum(h, 0.0) @ w1 + b1
    h = jnp.maximum(h, 0.0) @ w2 + b2
    logits = jnp.maximum(h, 0.0) @ w3 + b3
    return jax.nn.softmax(logits, axis=-1)


if __name__ == "__main__":
    key = jax.random.PRNGKey(0)
    kx, kp = jax.random.split(key)

    # small shapes: batch=2, 1 channel, 8x8 "image" -> d_in=64, d_hidden=32, d_out=10
    B, C, H, W = 2, 1, 8, 8
    d_in, d_hidden, d_out = C * H * W, 32, 10

    pixel_values = jax.random.normal(kx, (B, C, H, W), jnp.float32)
    params = init_params(kp, d_in, d_hidden, d_out)

    probs = mlp_forward(pixel_values, params)
    probs = jax.block_until_ready(probs)

    assert probs.shape == (B, d_out)
    # softmax rows must sum to ~1 (exact f32 divide in-kernel; only the bf16
    # output store quantizes the probabilities, <~2e-3 worst case)
    assert bool(jnp.all(jnp.abs(jnp.sum(probs, axis=-1) - 1.0) < 5e-3))
    # match the f32 reference (bf16 matmuls / bf16 output -> loose tolerance)
    ref = mlp_reference(pixel_values, params)
    assert bool(jnp.all(jnp.abs(probs - ref) < 2e-2))
    print("KERNEL_OK")
</pallas_src>

<mosaic_0001>
module attributes {stable_mosaic.version = 11 : i64} {
  func.func @mlp_kernel(%arg0: i32, %arg1: memref<8x64xf32, #tpu.memory_space<vmem>>, %arg2: memref<64x128xbf16, #tpu.memory_space<vmem>>, %arg3: memref<1x128xf32, #tpu.memory_space<vmem>>, %arg4: memref<128x128xbf16, #tpu.memory_space<vmem>>, %arg5: memref<1x128xf32, #tpu.memory_space<vmem>>, %arg6: memref<128x128xbf16, #tpu.memory_space<vmem>>, %arg7: memref<1x128xf32, #tpu.memory_space<vmem>>, %arg8: memref<128x128xbf16, #tpu.memory_space<vmem>>, %arg9: memref<1x128xf32, #tpu.memory_space<vmem>>, %arg10: memref<8x128xbf16, #tpu.memory_space<vmem>>) attributes {dimension_semantics = [#tpu.dimension_semantics<parallel>], iteration_bounds = array<i64: 1>, scalar_prefetch = 0 : i64, scratch_operands = 0 : i64, tpu.core_type = #tpu.core_type<tc>, window_params = [{transform_indices = @transform_0, window_bounds = array<i64: 8, 64>}, {pipeline_mode = #tpu.pipeline_mode<synchronous>, transform_indices = @transform_1, window_bounds = array<i64: 64, 128>}, {pipeline_mode = #tpu.pipeline_mode<synchronous>, transform_indices = @transform_2, window_bounds = array<i64: 1, 128>}, {pipeline_mode = #tpu.pipeline_mode<synchronous>, transform_indices = @transform_3, window_bounds = array<i64: 128, 128>}, {pipeline_mode = #tpu.pipeline_mode<synchronous>, transform_indices = @transform_4, window_bounds = array<i64: 1, 128>}, {pipeline_mode = #tpu.pipeline_mode<synchronous>, transform_indices = @transform_5, window_bounds = array<i64: 128, 128>}, {pipeline_mode = #tpu.pipeline_mode<synchronous>, transform_indices = @transform_6, window_bounds = array<i64: 1, 128>}, {pipeline_mode = #tpu.pipeline_mode<synchronous>, transform_indices = @transform_7, window_bounds = array<i64: 128, 128>}, {pipeline_mode = #tpu.pipeline_mode<synchronous>, transform_indices = @transform_8, window_bounds = array<i64: 1, 128>}, {transform_indices = @transform_9, window_bounds = array<i64: 8, 128>}]} {
    %c0 = arith.constant 0 : index
    %c0_0 = arith.constant 0 : index
    %0 = vector.load %arg1[%c0, %c0_0] : memref<8x64xf32, #tpu.memory_space<vmem>>, vector<8x64xf32>
    %1 = arith.truncf %0 : vector<8x64xf32> to vector<8x64xbf16>
    %c0_1 = arith.constant 0 : index
    %c0_2 = arith.constant 0 : index
    %2 = vector.load %arg2[%c0_1, %c0_2] : memref<64x128xbf16, #tpu.memory_space<vmem>>, vector<64x128xbf16>
    %cst = arith.constant dense<0.000000e+00> : vector<8x128xf32>
    %3 = tpu.matmul %1, %2, %cst {dimension_numbers = #tpu.dot_dimension_numbers<[1], [0], [0], [1], [0, 0, 1, 1], [], []>} : vector<8x64xbf16>, vector<64x128xbf16>, vector<8x128xf32> -> vector<8x128xf32>
    %c0_3 = arith.constant 0 : index
    %c0_4 = arith.constant 0 : index
    %4 = vector.load %arg3[%c0_3, %c0_4] : memref<1x128xf32, #tpu.memory_space<vmem>>, vector<1x128xf32>
    %5 = vector.broadcast %4 : vector<1x128xf32> to vector<8x128xf32>
    %6 = arith.addf %3, %5 : vector<8x128xf32>
    %cst_5 = arith.constant 0.000000e+00 : f32
    %7 = vector.broadcast %cst_5 : f32 to vector<8x128xf32>
    %8 = arith.maximumf %6, %7 : vector<8x128xf32>
    %9 = arith.truncf %8 : vector<8x128xf32> to vector<8x128xbf16>
    %c0_6 = arith.constant 0 : index
    %c0_7 = arith.constant 0 : index
    %10 = vector.load %arg4[%c0_6, %c0_7] : memref<128x128xbf16, #tpu.memory_space<vmem>>, vector<128x128xbf16>
    %cst_8 = arith.constant dense<0.000000e+00> : vector<8x128xf32>
    %11 = tpu.matmul %9, %10, %cst_8 {dimension_numbers = #tpu.dot_dimension_numbers<[1], [0], [0], [1], [0, 0, 1, 1], [], []>} : vector<8x128xbf16>, vector<128x128xbf16>, vector<8x128xf32> -> vector<8x128xf32>
    %c0_9 = arith.constant 0 : index
    %c0_10 = arith.constant 0 : index
    %12 = vector.load %arg5[%c0_9, %c0_10] : memref<1x128xf32, #tpu.memory_space<vmem>>, vector<1x128xf32>
    %13 = vector.broadcast %12 : vector<1x128xf32> to vector<8x128xf32>
    %14 = arith.addf %11, %13 : vector<8x128xf32>
    %cst_11 = arith.constant 0.000000e+00 : f32
    %15 = vector.broadcast %cst_11 : f32 to vector<8x128xf32>
    %16 = arith.maximumf %14, %15 : vector<8x128xf32>
    %17 = arith.truncf %16 : vector<8x128xf32> to vector<8x128xbf16>
    %c0_12 = arith.constant 0 : index
    %c0_13 = arith.constant 0 : index
    %18 = vector.load %arg6[%c0_12, %c0_13] : memref<128x128xbf16, #tpu.memory_space<vmem>>, vector<128x128xbf16>
    %cst_14 = arith.constant dense<0.000000e+00> : vector<8x128xf32>
    %19 = tpu.matmul %17, %18, %cst_14 {dimension_numbers = #tpu.dot_dimension_numbers<[1], [0], [0], [1], [0, 0, 1, 1], [], []>} : vector<8x128xbf16>, vector<128x128xbf16>, vector<8x128xf32> -> vector<8x128xf32>
    %c0_15 = arith.constant 0 : index
    %c0_16 = arith.constant 0 : index
    %20 = vector.load %arg7[%c0_15, %c0_16] : memref<1x128xf32, #tpu.memory_space<vmem>>, vector<1x128xf32>
    %21 = vector.broadcast %20 : vector<1x128xf32> to vector<8x128xf32>
    %22 = arith.addf %19, %21 : vector<8x128xf32>
    %cst_17 = arith.constant 0.000000e+00 : f32
    %23 = vector.broadcast %cst_17 : f32 to vector<8x128xf32>
    %24 = arith.maximumf %22, %23 : vector<8x128xf32>
    %25 = arith.truncf %24 : vector<8x128xf32> to vector<8x128xbf16>
    %c0_18 = arith.constant 0 : index
    %c0_19 = arith.constant 0 : index
    %26 = vector.load %arg8[%c0_18, %c0_19] : memref<128x128xbf16, #tpu.memory_space<vmem>>, vector<128x128xbf16>
    %cst_20 = arith.constant dense<0.000000e+00> : vector<8x128xf32>
    %27 = tpu.matmul %25, %26, %cst_20 {dimension_numbers = #tpu.dot_dimension_numbers<[1], [0], [0], [1], [0, 0, 1, 1], [], []>} : vector<8x128xbf16>, vector<128x128xbf16>, vector<8x128xf32> -> vector<8x128xf32>
    %c0_21 = arith.constant 0 : index
    %c0_22 = arith.constant 0 : index
    %28 = vector.load %arg9[%c0_21, %c0_22] : memref<1x128xf32, #tpu.memory_space<vmem>>, vector<1x128xf32>
    %29 = vector.broadcast %28 : vector<1x128xf32> to vector<8x128xf32>
    %30 = arith.addf %27, %29 : vector<8x128xf32>
    %31 = tpu.iota {dimensions = array<i32: 1>} : vector<8x128xi32>
    %c10_i32 = arith.constant 10 : i32
    %32 = vector.broadcast %c10_i32 : i32 to vector<8x128xi32>
    %33 = arith.cmpi slt, %31, %32 : vector<8x128xi32>
    %cst_23 = arith.constant -1.000000e+30 : f32
    %34 = vector.broadcast %cst_23 : f32 to vector<8x128xf32>
    %35 = arith.select %33, %30, %34 : vector<8x128xi1>, vector<8x128xf32>
    %cst_24 = arith.constant dense<0xFF800000> : vector<8xf32>
    %36 = vector.multi_reduction <maximumf>, %35, %cst_24 [1] : vector<8x128xf32> to vector<8xf32>
    %37 = vector.shape_cast %36 : vector<8xf32> to vector<8x1xf32>
    %38 = vector.broadcast %37 : vector<8x1xf32> to vector<8x128xf32>
    %39 = arith.subf %35, %38 : vector<8x128xf32>
    %40 = math.exp %39 : vector<8x128xf32>
    %cst_25 = arith.constant dense<0.000000e+00> : vector<8xf32>
    %41 = vector.multi_reduction <add>, %40, %cst_25 [1] : vector<8x128xf32> to vector<8xf32>
    %42 = vector.shape_cast %41 : vector<8xf32> to vector<8x1xf32>
    %43 = vector.broadcast %42 : vector<8x1xf32> to vector<8x128xf32>
    %44 = arith.divf %40, %43 : vector<8x128xf32>
    %45 = arith.truncf %44 : vector<8x128xf32> to vector<8x128xbf16>
    %c0_26 = arith.constant 0 : index
    %c0_27 = arith.constant 0 : index
    %46 = vector.load %arg10[%c0_26, %c0_27] : memref<8x128xbf16, #tpu.memory_space<vmem>>, vector<8x128xbf16>
    tpu.vector_store %arg10[%c0_26, %c0_27], %45 {strides = array<i32>} : memref<8x128xbf16, #tpu.memory_space<vmem>>, vector<8x128xbf16>,
    return
  }
  func.func @transform_0(%arg0: i32) -> (i32, i32) {
    %c0_i32 = arith.constant 0 : i32
    %c0_i32_0 = arith.constant 0 : i32
    return %arg0, %c0_i32 : i32, i32
  }
  func.func @transform_1(%arg0: i32) -> (i32, i32) {
    %c0_i32 = arith.constant 0 : i32
    %c0_i32_0 = arith.constant 0 : i32
    %c0_i32_1 = arith.constant 0 : i32
    return %c0_i32, %c0_i32_0 : i32, i32
  }
  func.func @transform_2(%arg0: i32) -> (i32, i32) {
    %c0_i32 = arith.constant 0 : i32
    %c0_i32_0 = arith.constant 0 : i32
    %c0_i32_1 = arith.constant 0 : i32
    return %c0_i32, %c0_i32_0 : i32, i32
  }
  func.func @transform_3(%arg0: i32) -> (i32, i32) {
    %c0_i32 = arith.constant 0 : i32
    %c0_i32_0 = arith.constant 0 : i32
    %c0_i32_1 = arith.constant 0 : i32
    return %c0_i32, %c0_i32_0 : i32, i32
  }
  func.func @transform_4(%arg0: i32) -> (i32, i32) {
    %c0_i32 = arith.constant 0 : i32
    %c0_i32_0 = arith.constant 0 : i32
    %c0_i32_1 = arith.constant 0 : i32
    return %c0_i32, %c0_i32_0 : i32, i32
  }
  func.func @transform_5(%arg0: i32) -> (i32, i32) {
    %c0_i32 = arith.constant 0 : i32
    %c0_i32_0 = arith.constant 0 : i32
    %c0_i32_1 = arith.constant 0 : i32
    return %c0_i32, %c0_i32_0 : i32, i32
  }
  func.func @transform_6(%arg0: i32) -> (i32, i32) {
    %c0_i32 = arith.constant 0 : i32
    %c0_i32_0 = arith.constant 0 : i32
    %c0_i32_1 = arith.constant 0 : i32
    return %c0_i32, %c0_i32_0 : i32, i32
  }
  func.func @transform_7(%arg0: i32) -> (i32, i32) {
    %c0_i32 = arith.constant 0 : i32
    %c0_i32_0 = arith.constant 0 : i32
    %c0_i32_1 = arith.constant 0 : i32
    return %c0_i32, %c0_i32_0 : i32, i32
  }
  func.func @transform_8(%arg0: i32) -> (i32, i32) {
    %c0_i32 = arith.constant 0 : i32
    %c0_i32_0 = arith.constant 0 : i32
    %c0_i32_1 = arith.constant 0 : i32
    return %c0_i32, %c0_i32_0 : i32, i32
  }
  func.func @transform_9(%arg0: i32) -> (i32, i32) {
    %c0_i32 = arith.constant 0 : i32
    %c0_i32_0 = arith.constant 0 : i32
    return %arg0, %c0_i32 : i32, i32
  }
}

</mosaic_0001>

<bundles_post_ra>
// kernel: tpu_custom_call.1
= control target key start
LH: loop header
LB: loop body
LE: loop exit
PB: predicated region body
PF: predicated region fallthrough
CT: control target
= control target key end

     0   :  { %14 = vsyncpa [#allocation3], 0  ;;  %s1001_s0 = inlined_call_operand.hbm [shape: f32[8,64], index: 0, kind: input, shape index: {}]   ;;  %s1002_s1 = inlined_call_operand.hbm [shape: bf16[64,128], index: 1, kind: input, shape index: {}]   ;;  %s1003_s2 = inlined_call_operand.vmem [shape: f32[1,128], index: 2, kind: input, shape index: {}]   ;;  %s1004_s3 = inlined_call_operand.hbm [shape: bf16[128,128], index: 3, kind: input, shape index: {}]   ;;  %s1005_s4 = inlined_call_operand.vmem [shape: f32[1,128], index: 4, kind: input, shape index: {}]   ;;  %s1006_s5 = inlined_call_operand.hbm [shape: bf16[128,128], index: 5, kind: input, shape index: {}]   ;;  %s1007_s6 = inlined_call_operand.vmem [shape: f32[1,128], index: 6, kind: input, shape index: {}]   ;;  %s1008_s7 = inlined_call_operand.hbm [shape: bf16[128,128], index: 7, kind: input, shape index: {}]   ;;  %s1009_s8 = inlined_call_operand.vmem [shape: f32[1,128], index: 8, kind: input, shape index: {}]   ;;  %s1010_s9 = inlined_call_operand.hbm [shape: bf16[8,128], index: 9, kind: output, shape index: {}]  }
   0x1   :  { %15 = vsyncpa [#allocation6], 0 }
   0x2   :  { %16 = vsyncpa [#allocation9], 0 }
   0x3   :  { %17 = vsyncpa [#allocation4], 0  ;;  %s863_s30 = smov [#allocation5]  }
   0x4   :  { %s33_s10 = sshll.u32 %s863_s30, 4  ;;  %s34_s10 = int_to_ptr.vmem [resolvable:$true] %s33_s10 }
   0x5   :  { %s743_s11 = scalar_lea.vmem %s34_s10, 512  ;;  %p748_p1 = scmp.lt.s32.totalorder %s34_s10, %s34_s10 }
   0x6   :  { %p744_p0 = scmp.ne.s32.totalorder %s34_s10, %s743_s11  ;;  %p749_p2 = scmp.lt.s32.totalorder %s743_s11, %s743_s11 }
   0x8   :  { %p750_p3 = por %p749_p2, %p748_p1 }
   0xa   :  { %p751_p4 = pnand %p750_p3, %p744_p0 }
   0xc   :  { %754 = shalt.err (!%p751_p4)
}
   0xd   :  { %s864_s12 = smov 64   ;;  %s865_s13 = smov 4  }
   0xe   :  { %39 = dma.hbm_to_vmem [thread:$0]  %s1002_s1, 512, %s34_s10, [#allocation6], %s864_s12, %s864_s12, %s865_s13  }
   0xf   :  { %s866_s16 = smov [#allocation8]   ;;  %s867_s18 = smov [#allocation2]  }
  0x10   :  { %s61_s17 = sshll.u32 %s866_s16, 4  ;;  %s24_s19 = sshll.u32 %s867_s18, 4  ;;  %s62_s17 = int_to_ptr.vmem [resolvable:$true] %s61_s17  ;;  %s25_s19 = int_to_ptr.vmem [resolvable:$true] %s24_s19 }
  0x11   :  { %s763_s20 = scalar_lea.vmem %s62_s17, 1024  ;;  %p768_p6 = scmp.lt.s32.totalorder %s62_s17, %s62_s17 }
  0x12   :  { %p764_p5 = scmp.ne.s32.totalorder %s62_s17, %s763_s20  ;;  %p769_p7 = scmp.lt.s32.totalorder %s763_s20, %s763_s20 }
  0x14   :  { %p770_p8 = por %p769_p7, %p768_p6 }
  0x16   :  { %p771_p9 = pnand %p770_p8, %p764_p5 }
  0x18   :  { %774 = shalt.err (!%p771_p9)
}
  0x19   :  { %67 = dma.hbm_to_vmem [thread:$0]  %s1006_s5, 1024, %s62_s17, [#allocation9], %s864_s12, %s864_s12, %s865_s13  }
  0x1a   :  { %s783_s1 = scalar_lea.vmem %s25_s19, 128  ;;  %p788_p11 = scmp.lt.s32.totalorder %s25_s19, %s25_s19 }
  0x1b   :  { %p784_p10 = scmp.ne.s32.totalorder %s25_s19, %s783_s1  ;;  %p789_p12 = scmp.lt.s32.totalorder %s783_s1, %s783_s1 }
  0x1d   :  { %p790_p13 = por %p789_p12, %p788_p11 }
  0x1f   :  { %p791_p0 = pnand %p790_p13, %p784_p10 }
  0x21   :  { %794 = shalt.err (!%p791_p0)
}
  0x22   :  { %27 = dma.hbm_to_vmem [thread:$0]  %s1001_s0, 128, %s25_s19, [#allocation3]  }
  0x23   :  { %s868_s25 = smov [#allocation7]   ;;  %s869_s27 = smov [#allocation10]  }
  0x24   :  { %s47_s26 = sshll.u32 %s868_s25, 4  ;;  %s75_s28 = sshll.u32 %s869_s27, 4  ;;  %s48_s26 = int_to_ptr.vmem [resolvable:$true] %s47_s26  ;;  %s76_s28 = int_to_ptr.vmem [resolvable:$true] %s75_s28 }
  0x25   :  { %s803_s29 = scalar_lea.vmem %s48_s26, 1024  ;;  %p808_p2 = scmp.lt.s32.totalorder %s48_s26, %s48_s26 }
  0x26   :  { %p804_p1 = scmp.ne.s32.totalorder %s48_s26, %s803_s29  ;;  %p809_p3 = scmp.lt.s32.totalorder %s803_s29, %s803_s29 }
  0x28   :  { %p810_p4 = por %p809_p3, %p808_p2 }
  0x2a   :  { %p811_p5 = pnand %p810_p4, %p804_p1 }
  0x2c   :  { %814 = shalt.err (!%p811_p5)
}
  0x2d   :  { %53 = dma.hbm_to_vmem [thread:$0]  %s1004_s3, 1024, %s48_s26, [#allocation6], %s864_s12, %s864_s12, %s865_s13  }
  0x2e   :  { %s823_s0 = scalar_lea.vmem %s76_s28, 1024  ;;  %p828_p7 = scmp.lt.s32.totalorder %s76_s28, %s76_s28 }
  0x2f   :  { %p824_p6 = scmp.ne.s32.totalorder %s76_s28, %s823_s0  ;;  %p829_p8 = scmp.lt.s32.totalorder %s823_s0, %s823_s0 }
  0x31   :  { %p830_p9 = por %p829_p8, %p828_p7 }
  0x33   :  { %p831_p10 = pnand %p830_p9, %p824_p6 }
  0x35   :  { %834 = shalt.err (!%p831_p10)
}
  0x36   :  { %81 = dma.hbm_to_vmem [thread:$0]  %s1008_s7, 1024, %s76_s28, [#allocation9], %s864_s12, %s864_s12, %s865_s13  }
  0x37   :  { %855 = dma.done.wait [#allocation3], 128  }
  0x38   :  { %856 = vsyncadd [#allocation3], 4294967168 }
  0x39   :  { %857 = dma.done.wait [#allocation6], 1536  }
  0x3a   :  { %858 = vsyncadd [#allocation6], 4294965760 }
  0x3b   :  { %859 = dma.done.wait [#allocation9], 2048  }
  0x3c   :  { %860 = vsyncadd [#allocation9], 4294965248  ;;  %v870_v0 = vmov 0.0   ;;  %vm871_vm0 = vmmov 0   ;;  %v703_v1 = vld [vmem:[#allocation5 + $0x18] sm:$0xff]   ;;  %v704_v2 = vld [vmem:[#allocation5 + $0x10] sm:$0xff]   ;;  %v524_v55 = vlaneseq }
  0x3d   :  { %621 = vmatprep.subr.bf16.mxu0 %v870_v0  ;;  %629 = vmatprep.mubr.msk.bf16.mxu0 %vm871_vm0, %v870_v0  ;;  %v707_v3 = vld [vmem:[#allocation7 + $0x38] sm:$0xff]   ;;  %v705_v4 = vld [vmem:[#allocation5 + $0x8] sm:$0xff]   ;;  %v708_v5 = vld [vmem:[#allocation7 + $0x30] sm:$0xff]   ;;  %vm141_vm1 = vcmask 523264  }
  0x3e   :  { %633 = vmatprep.subr.bf16.mxu1 %v870_v0  ;;  %649 = vmatprep.mubr.msk.bf16.mxu1 %vm871_vm0, %v870_v0  ;;  %v706_v6 = vld [vmem:[#allocation5] sm:$0xff]   ;;  %v100_v7 = vld [vmem:[#allocation2] sm:$0xff]  ;;  %v709_v8 = vld [vmem:[#allocation7 + $0x28] sm:$0xff]   ;;  %v525_v56 = vand.u32 127, %v524_v55 }
  0x3f   :  { %622 = vmatpush3.bf16.msra.mxu0 %v703_v1  ;;  %634 = vmatpush3.bf16.msra.mxu1 %v707_v3  ;;  %v101_v9 = vpack.c.bf16 %v100_v7, %v100_v7  ;;  %v710_v10 = vld [vmem:[#allocation7 + $0x20] sm:$0xff]   ;;  %v711_v11 = vld [vmem:[#allocation7 + $0x18] sm:$0xff]   ;;  %v712_v12 = vld [vmem:[#allocation7 + $0x10] sm:$0xff]  }
  0x40   :  { %623 = vmatprep.subr.bf16.mxu0 %v870_v0  ;;  %635 = vmatprep.subr.bf16.mxu1 %v870_v0  ;;  %v713_v13 = vld [vmem:[#allocation7 + $0x8] sm:$0xff]   ;;  %v714_v14 = vld [vmem:[#allocation7] sm:$0xff]   ;;  %v715_v15 = vld [vmem:[#allocation8 + $0x38] sm:$0xff]   ;;  %vm526_vm2 = vcmp.lt.s32.totalorder %v525_v56, 10 }
  0x41   :  { %v716_v16 = vld [vmem:[#allocation8 + $0x30] sm:$0xff]   ;;  %v717_v17 = vld [vmem:[#allocation8 + $0x28] sm:$0xff]   ;;  %v718_v18 = vld [vmem:[#allocation8 + $0x20] sm:$0xff]  }
  0x42   :  { %v719_v19 = vld [vmem:[#allocation8 + $0x18] sm:$0xff]   ;;  %v720_v20 = vld [vmem:[#allocation8 + $0x10] sm:$0xff]   ;;  %v721_v29 = vld [vmem:[#allocation8 + $0x8] sm:$0xff]  }
  0x43   :  { %624 = vmatpush3.bf16.msra.mxu0 %v704_v2  ;;  %636 = vmatpush3.bf16.msra.mxu1 %v708_v5  ;;  %v556_v21 = vld [vmem:[%s1003_s2] ss:$0 sm:$0xff]  ;;  %v722_v30 = vld [vmem:[#allocation8] sm:$0xff]   ;;  %v724_v32 = vld [vmem:[#allocation10 + $0x30] sm:$0xff]  }
  0x44   :  { %625 = vmatprep.subr.bf16.mxu0 %v870_v0  ;;  %637 = vmatprep.subr.bf16.mxu1 %v870_v0  ;;  %v723_v31 = vld [vmem:[#allocation10 + $0x38] sm:$0xff]   ;;  %v725_v33 = vld [vmem:[#allocation10 + $0x28] sm:$0xff]   ;;  %v726_v34 = vld [vmem:[#allocation10 + $0x20] sm:$0xff]  }
  0x45   :  { %v727_v35 = vld [vmem:[#allocation10 + $0x18] sm:$0xff]   ;;  %v728_v36 = vld [vmem:[#allocation10 + $0x10] sm:$0xff]   ;;  %v729_v45 = vld [vmem:[#allocation10 + $0x8] sm:$0xff]  }
  0x46   :  { %v562_v37 = vld [vmem:[%s1005_s4] ss:$0 sm:$0xff]  ;;  %v730_v46 = vld [vmem:[#allocation10] sm:$0xff]  }
  0x47   :  { %626 = vmatpush3.bf16.msra.mxu0 %v705_v4  ;;  %638 = vmatpush3.bf16.msra.mxu1 %v709_v8  ;;  %v571_v47 = vld [vmem:[%s1007_s6] ss:$0 sm:$0xff]  ;;  %s872_s6 = smov [#allocation11]  }
  0x48   :  { %627 = vmatprep.subr.bf16.mxu0 %v870_v0  ;;  %639 = vmatprep.subr.bf16.mxu1 %v870_v0  ;;  %v580_v57 = vld [vmem:[%s1009_s8] ss:$0 sm:$0xff]  ;;  %s545_s16 = sshll.u32 %s872_s6, 4  ;;  %s546_s16 = int_to_ptr.vmem [resolvable:$true] %s545_s16 }
  0x49   :  { %s835_s8 = scalar_lea.vmem %s546_s16, 64  ;;  %p840_p12 = scmp.lt.s32.totalorder %s546_s16, %s546_s16 }
  0x4a   :  { %p836_p11 = scmp.ne.s32.totalorder %s546_s16, %s835_s8  ;;  %p841_p13 = scmp.lt.s32.totalorder %s835_s8, %s835_s8 }
  0x4b   :  { %628 = vmatpush3.bf16.msra.mxu0 %v706_v6  ;;  %640 = vmatpush3.bf16.msra.mxu1 %v710_v10 }
  0x4c   :  { %653 = vmatprep.subr.bf16.mxu0 %v870_v0  ;;  %641 = vmatprep.subr.bf16.mxu1 %v870_v0  ;;  %p842_p0 = por %p841_p13, %p840_p12 }
  0x4e   :  { %630 = vmatmul.mubr.msk.bf16.vlgmr.msra.gmra.mxu0 %vm141_vm1, %v101_v9  ;;  %p843_p1 = pnand %p842_p0, %p836_p11 }
  0x4f   :  { %669 = vmatprep.mubr.msk.bf16.mxu0 %vm871_vm0, %v870_v0  ;;  %642 = vmatpush3.bf16.msra.mxu1 %v711_v11 }
  0x50   :  { %643 = vmatprep.subr.bf16.mxu1 %v870_v0  ;;  %654 = vmatpush3.bf16.msra.mxu0 %v715_v15 }
  0x51   :  { %655 = vmatprep.subr.bf16.mxu0 %v870_v0 }
  0x53   :  { %644 = vmatpush3.bf16.msra.mxu1 %v712_v12 }
  0x54   :  { %645 = vmatprep.subr.bf16.mxu1 %v870_v0  ;;  %656 = vmatpush3.bf16.msra.mxu0 %v716_v16 }
  0x55   :  { %657 = vmatprep.subr.bf16.mxu0 %v870_v0 }
  0x57   :  { %646 = vmatpush3.bf16.msra.mxu1 %v713_v13 }
  0x58   :  { %647 = vmatprep.subr.bf16.mxu1 %v870_v0  ;;  %658 = vmatpush3.bf16.msra.mxu0 %v717_v17 }
  0x59   :  { %659 = vmatprep.subr.bf16.mxu0 %v870_v0 }
  0x5b   :  { %648 = vmatpush3.bf16.msra.mxu1 %v714_v14 }
  0x5c   :  { %673 = vmatprep.subr.bf16.mxu1 %v870_v0  ;;  %660 = vmatpush3.bf16.msra.mxu0 %v718_v18 }
  0x5d   :  { %661 = vmatprep.subr.bf16.mxu0 %v870_v0 }
  0x60   :  { %662 = vmatpush3.bf16.msra.mxu0 %v719_v19 }
  0x61   :  { %663 = vmatprep.subr.bf16.mxu0 %v870_v0 }
  0x64   :  { %664 = vmatpush3.bf16.msra.mxu0 %v720_v20 }
  0x65   :  { %665 = vmatprep.subr.bf16.mxu0 %v870_v0 }
  0x68   :  { %666 = vmatpush3.bf16.msra.mxu0 %v721_v29 }
  0x69   :  { %667 = vmatprep.subr.bf16.mxu0 %v870_v0 }
  0x6c   :  { %668 = vmatpush3.bf16.msra.mxu0 %v722_v30 }
 0x10e   :  { %v179_v22 = vpop.f32.mrf.mxu0 }
 0x10f   :  { %v180_v23 = vadd.f32 %v556_v21, %v179_v22 }
 0x110   :  { %v631_v24 = vpop.f32.mrf.mxu0 }
 0x111   :  { %v185_v25 = vmax.f32 %v180_v23, 0.0 }
 0x112   :  { %v182_v26 = vpop.f32.mrf.mxu0 }
 0x113   :  { %v186_v27 = vpack.c.bf16 %v185_v25, %v185_v25 }
 0x114   :  { %v632_v28 = vpop.f32.mrf.mxu0 }
 0x115   :  { %650 = vmatmul.mubr.bf16.vlgmr.msra.gmra.mxu1 %v186_v27 }
 0x116   :  { %689 = vmatprep.mubr.msk.bf16.mxu1 %vm871_vm0, %v870_v0  ;;  %674 = vmatpush3.bf16.msra.mxu1 %v723_v31 }
 0x117   :  { %675 = vmatprep.subr.bf16.mxu1 %v870_v0 }
 0x11a   :  { %676 = vmatpush3.bf16.msra.mxu1 %v724_v32 }
 0x11b   :  { %677 = vmatprep.subr.bf16.mxu1 %v870_v0 }
 0x11e   :  { %678 = vmatpush3.bf16.msra.mxu1 %v725_v33 }
 0x11f   :  { %679 = vmatprep.subr.bf16.mxu1 %v870_v0 }
 0x122   :  { %680 = vmatpush3.bf16.msra.mxu1 %v726_v34 }
 0x123   :  { %681 = vmatprep.subr.bf16.mxu1 %v870_v0 }
 0x126   :  { %682 = vmatpush3.bf16.msra.mxu1 %v727_v35 }
 0x127   :  { %683 = vmatprep.subr.bf16.mxu1 %v870_v0 }
 0x12a   :  { %684 = vmatpush3.bf16.msra.mxu1 %v728_v36 }
 0x12b   :  { %685 = vmatprep.subr.bf16.mxu1 %v870_v0 }
 0x12e   :  { %686 = vmatpush3.bf16.msra.mxu1 %v729_v45 }
 0x12f   :  { %687 = vmatprep.subr.bf16.mxu1 %v870_v0 }
 0x132   :  { %688 = vmatpush3.bf16.msra.mxu1 %v730_v46 }
 0x1d5   :  { %v292_v38 = vpop.f32.mrf.mxu1 }
 0x1d6   :  { %v293_v39 = vadd.f32 %v562_v37, %v292_v38 }
 0x1d7   :  { %v651_v40 = vpop.f32.mrf.mxu1 }
 0x1d8   :  { %v298_v41 = vmax.f32 %v293_v39, 0.0 }
 0x1d9   :  { %v295_v42 = vpop.f32.mrf.mxu1 }
 0x1da   :  { %v299_v43 = vpack.c.bf16 %v298_v41, %v298_v41 }
 0x1db   :  { %v652_v44 = vpop.f32.mrf.mxu1 }
 0x1dc   :  { %670 = vmatmul.mubr.bf16.vlgmr.msra.gmra.mxu0 %v299_v43 }
 0x29c   :  { %v405_v48 = vpop.f32.mrf.mxu0 }
 0x29d   :  { %v406_v49 = vadd.f32 %v571_v47, %v405_v48 }
 0x29e   :  { %v671_v50 = vpop.f32.mrf.mxu0 }
 0x29f   :  { %v411_v51 = vmax.f32 %v406_v49, 0.0 }
 0x2a0   :  { %v408_v52 = vpop.f32.mrf.mxu0 }
 0x2a1   :  { %v412_v53 = vpack.c.bf16 %v411_v51, %v411_v51 }
 0x2a2   :  { %v672_v54 = vpop.f32.mrf.mxu0 }
 0x2a3   :  { %690 = vmatmul.mubr.bf16.vlgmr.msra.gmra.mxu1 %v412_v53 }
 0x363   :  { %v518_v58 = vpop.f32.mrf.mxu1 }
 0x364   :  { %v519_v59 = vadd.f32 %v580_v57, %v518_v58 }
 0x365   :  { %v691_v60 = vpop.f32.mrf.mxu1 }
 0x366   :  { %v527_v61 = vsel %vm526_vm2, %v519_v59, -1e+30 }
 0x367   :  { %528 = vmax.xlane.f32.xlu0 %v527_v61  ;;  %v521_v62 = vpop.f32.mrf.mxu1 }
 0x369   :  { %v692_v63 = vpop.f32.mrf.mxu1 }
 0x3f0   :  { %v529_v0 = vpop.xlane.xlu0 %528 }
 0x3f1   :  { %v530_v1 = vsub.f32 %v527_v61, %v529_v0 }
 0x3f3   :  { %v531_v2 = vmul.f32 1.442695, %v530_v1 }
 0x3f5   :  { %731 = vpow2.f32 %v531_v2 }
 0x402   :  { %v732_v3 = vpop.eup %731 }
 0x403   :  { %533 = vadd.xlane.f32.xlu0 %v732_v3 }
 0x48c   :  { %v534_v4 = vpop.xlane.xlu0 %533 }
 0x48d   :  { %733 = vrcp.f32 %v534_v4 }
 0x49a   :  { %v734_v5 = vpop.eup %733 }
 0x49b   :  { %v536_v6 = vmul.f32 %v734_v5, %v732_v3 }
 0x49d   :  { %v537_v7 = vpack.c.bf16 %v536_v6, %v536_v6 }
 0x49f   :  { %538 = vst [vmem:[#allocation11] sm:$0xf] %v537_v7 }
 0x4a0   :  { %846 = shalt.err (!%p843_p1)
}
 0x4a1   :  { %548 = dma.vmem_to_hbm [thread:$0]  %s546_s16, 64, %s1010_s9, [#allocation4]  }
 0x4a2   :  { %861 = dma.done.wait [#allocation4], 64  }
 0x4a3   :  { %862 = vsyncadd [#allocation4], 4294967232 }
 0x4a4   :  { %552 = vsyncpa [#allocation3], 1 }
 0x4a5   :  { %553 = vsyncpa [#allocation6], 1 }
 0x4a6   :  { %554 = vsyncpa [#allocation9], 1 }
 0x4a7   :  { %555 = vsyncpa [#allocation4], 1 }

</bundles_post_ra>
